<compile_context>
chip_gen: v7x
topology: tpu7x:2x2x1
jax: 0.10.0
libtpu: 0.0.40
codegen_flags: <defaults>
</compile_context>

<pallas_src>
import functools

import jax
import jax.numpy as jnp
from jax import lax
from jax.experimental import pallas as pl
from jax.experimental.pallas import tpu as pltpu

# Large but finite mask value (flash-attention style).  Finite keeps the
# online-softmax rescaling NaN-free when a whole source chunk is masked.
_MASK_VALUE = -0.7 * float(jnp.finfo(jnp.float32).max)


def _round_up(x, m):
    return ((x + m - 1) // m) * m


def _luong_attn_kernel(S, St, has_mask, ragged, *refs):
    if has_mask:
        (g_ref, q_ref, w_ref, v_ref, bias_ref,
         ctx_ref, attn_ref, m_ref, l_ref, acc_ref) = refs
    else:
        (g_ref, q_ref, w_ref, v_ref,
         ctx_ref, attn_ref, m_ref, l_ref, acc_ref) = refs
        bias_ref = None

    s = pl.program_id(1)
    n_s = pl.num_programs(1)

    @pl.when(s == 0)
    def _init():
        m_ref[...] = jnp.full_like(m_ref, _MASK_VALUE)
        l_ref[...] = jnp.zeros_like(l_ref)
        acc_ref[...] = jnp.zeros_like(acc_ref)

    g = g_ref[0]                       # scalar gain from SMEM
    v = v_ref[...]                     # (St, bt, Dv), input dtype (no f32 copy)

    if ragged:
        # The last source chunk reads past the end of `value`; zero the
        # out-of-range rows so stale-VMEM garbage never reaches the math.
        row = lax.broadcasted_iota(jnp.int32, (St, v.shape[1], 1), 0) + s * St
        v = jnp.where(row < S, v, jnp.zeros_like(v))

    # q_proj = query @ W on the MXU (tiny next to the value stream).
    qp = jnp.dot(q_ref[...], w_ref[...],
                 preferred_element_type=jnp.float32)                 # (bt, Dv) f32

    # Raw scores for this chunk: multiply in the input dtype, accumulate the
    # Dv lane-reduction in f32, then one small XLU transpose to lane-major.
    prod = v * qp.astype(v.dtype)[None, :, :]                        # (St, bt, Dv)
    scores = jnp.sum(prod, axis=-1, dtype=jnp.float32).T * g         # (bt, St)
    if has_mask:
        scores = scores + bias_ref[0]                                # additive bias
    if ragged:
        col = lax.broadcasted_iota(jnp.int32, scores.shape, 1) + s * St
        scores = jnp.where(col < S, scores, _MASK_VALUE)

    # Stash raw scores in the VMEM-resident attention block; the exact softmax
    # over the full row is materialized once, lane-dense, at the last chunk.
    attn_ref[s] = scores

    # Online-softmax running stats for the context accumulator.
    m_prev = m_ref[...]                                              # (bt, 1)
    m_new = jnp.maximum(m_prev, jnp.max(scores, axis=-1, keepdims=True))
    alpha = jnp.exp(m_prev - m_new)                                  # (bt, 1)
    p = jnp.exp(scores - m_new)                                      # (bt, St), EUP
    l_ref[...] = alpha * l_ref[...] + jnp.sum(p, axis=-1, keepdims=True)
    p_sb = p.T.astype(v.dtype)                                       # (St, bt)
    ctx_part = jnp.sum(v * p_sb[:, :, None], axis=0,
                       dtype=jnp.float32)                            # (bt, Dv) f32
    acc_ref[...] = alpha * acc_ref[...] + ctx_part
    m_ref[...] = m_new

    @pl.when(s == n_s - 1)
    def _finalize():
        inv_l = pl.reciprocal(l_ref[...], approx=True)               # (bt, 1), EUP
        attn_ref[...] = jnp.exp(attn_ref[...] - m_ref[...]) * inv_l  # lane-dense
        ctx_ref[...] = (acc_ref[...] * inv_l).astype(ctx_ref.dtype)


def _vmem_bytes(bt, st, n_st, Dq, Dv, esize, has_mask):
    by = 2 * st * bt * Dv * esize                      # value chunks (double buffered)
    by += 2 * bt * Dq * esize + 2 * Dq * Dv * esize    # query tile + resident W
    by += 2 * n_st * bt * st * 4                       # resident attention block
    by += 2 * bt * Dv * esize                          # context output
    if has_mask:
        by += 2 * bt * st * 4                          # bias chunk
    by += bt * (Dv + 2) * 4                            # m / l / acc scratch
    by += 2 * st * bt * Dv * 4 + 8 * bt * st * 4       # in-kernel f32 temporaries
    return by


def _choose_tiles(B, S, Dq, Dv, esize, has_mask, budget):
    """Pick (batch_tile, s_tile, n_s_tiles) under a per-generation VMEM budget."""
    if B <= 8:
        bt_cands = [B]
    else:
        cap = min(128, _round_up(B, 8))
        if B >= 16:
            # keep >= 2 batch tiles so the "parallel" axis feeds both v7x cores
            cap = min(cap, max(8, _round_up(_round_up(B, 8) // 2, 8)))
        bt_cands = [c for c in (128, 64, 32, 16, 8) if c <= cap] or [8]
    st_cands = [S] + [c for c in (1024, 512, 256, 128) if c < S]
    for bt in bt_cands:                                # biggest batch tile first
        for st in st_cands:                            # full S preferred
            n_st = 1 if st == S else -(-S // st)
            if _vmem_bytes(bt, st, n_st, Dq, Dv, esize, has_mask) <= budget:
                return bt, st, n_st
    bt, st = bt_cands[-1], st_cands[-1]
    return bt, st, (1 if st == S else -(-S // st))


def luong_attention_pallas(query, value, W, g, key_padding_mask=None, *,
                           vmem_budget_bytes=24 * 1024 * 1024, s_tile=None):
    """LuongAttention forward.

    query: (B, Dq), value: (S, B, Dv), W = value_proj.weight (Dq, Dv), g scalar.
    key_padding_mask: optional (S, B) bool, True = padded position.
    Returns (context (B, Dv), attn (S, B) float32, next_state == attn).
    """
    S, B, Dv = value.shape
    Dq = query.shape[1]
    esize = jnp.dtype(value.dtype).itemsize
    has_mask = key_padding_mask is not None

    bt, St, n_st = _choose_tiles(B, S, Dq, Dv, esize, has_mask, vmem_budget_bytes)
    if s_tile is not None:                       # test / tuning override
        St = min(int(s_tile), S)
        n_st = -(-S // St)
    S_grid = n_st * St
    ragged = S_grid != S

    n_bt = -(-B // bt)
    b_pad = n_bt * bt
    if b_pad != B:
        pad = b_pad - B
        query = jnp.pad(query, ((0, pad), (0, 0)))
        value = jnp.pad(value, ((0, 0), (0, pad), (0, 0)))
        if has_mask:
            key_padding_mask = jnp.pad(key_padding_mask, ((0, 0), (0, pad)))

    g_arr = jnp.full((1,), g, jnp.float32)

    in_specs = [
        pl.BlockSpec(memory_space=pltpu.MemorySpace.SMEM),            # g (scalar)
        pl.BlockSpec((bt, Dq), lambda b, s: (b, 0)),                  # query tile
        pl.BlockSpec((Dq, Dv), lambda b, s: (0, 0)),                  # W (resident)
        pl.BlockSpec((St, bt, Dv), lambda b, s: (s, b, 0)),           # value chunk
    ]
    args = [g_arr, query, W, value]
    if has_mask:
        # lane-major additive bias, chunked along S: (n_st, b_pad, St) float32
        bias = jnp.where(key_padding_mask, _MASK_VALUE, 0.0).astype(jnp.float32).T
        if S_grid != S:
            bias = jnp.pad(bias, ((0, 0), (0, S_grid - S)))
        bias = jnp.transpose(bias.reshape(b_pad, n_st, St), (1, 0, 2))
        in_specs.append(pl.BlockSpec((1, bt, St), lambda b, s: (s, b, 0)))
        args.append(bias)

    out_shape = (
        jax.ShapeDtypeStruct((b_pad, Dv), value.dtype),               # context
        jax.ShapeDtypeStruct((n_st, b_pad, St), jnp.float32),         # attention
    )
    out_specs = [
        pl.BlockSpec((bt, Dv), lambda b, s: (b, 0)),
        pl.BlockSpec((n_st, bt, St), lambda b, s: (0, b, 0)),         # resident over s
    ]
    scratch_shapes = [
        pltpu.VMEM((bt, 1), jnp.float32),     # running max
        pltpu.VMEM((bt, 1), jnp.float32),     # running denominator
        pltpu.VMEM((bt, Dv), jnp.float32),    # context accumulator
    ]

    est = _vmem_bytes(bt, St, n_st, Dq, Dv, esize, has_mask)
    vmem_limit = int(min(max(est * 3 // 2, 32 * 1024 * 1024), 120 * 1024 * 1024))

    ctx_o, attn_o = pl.pallas_call(
        functools.partial(_luong_attn_kernel, S, St, has_mask, ragged),
        out_shape=out_shape,
        grid_spec=pltpu.PrefetchScalarGridSpec(
            num_scalar_prefetch=0,
            grid=(n_bt, n_st),
            in_specs=in_specs,
            out_specs=out_specs,
            scratch_shapes=scratch_shapes,
        ),
        compiler_params=pltpu.CompilerParams(
            dimension_semantics=("parallel", "arbitrary"),
            vmem_limit_bytes=vmem_limit,
        ),
    )(*args)

    context = ctx_o[:B]                                                # (B, Dv)
    attn = jnp.transpose(attn_o, (0, 2, 1)).reshape(S_grid, b_pad)[:S, :B]
    return context, attn, attn


def luong_reference(query, value, W, g, key_padding_mask=None):
    """Pure-JAX replica of the torch forward for correctness checking."""
    key = jnp.einsum('sbv,qv->sbq', value, W)             # value_proj(value)
    scores = g * jnp.einsum('bq,sbq->sb', query, key)     # (S, B)
    if key_padding_mask is not None:
        scores = jnp.where(key_padding_mask, -jnp.inf, scores)
    attn = jax.nn.softmax(scores, axis=0)
    ctx = jnp.einsum('sb,sbv->bv', attn, value)
    return ctx, attn


if __name__ == "__main__":
    def run_case(name, key, B, S, Dq, Dv, with_mask, s_tile=None):
        k1, k2, k3 = jax.random.split(key, 3)
        query = jax.random.normal(k1, (B, Dq), dtype=jnp.float32)
        value = jax.random.normal(k2, (S, B, Dv), dtype=jnp.float32)
        # value_proj.weight ~ U(-0.1, 0.1), shape (query_dim, value_dim); g = 1.0
        W = jax.random.uniform(k3, (Dq, Dv), dtype=jnp.float32,
                               minval=-0.1, maxval=0.1)
        g = 1.0
        mask = None
        if with_mask:
            # no fully padded source column -> no NaN in the reference
            mask = jnp.zeros((S, B), dtype=bool)
            mask = mask.at[S - 3:, 0].set(True).at[S - 1:, 1].set(True)

        ctx, attn, state = luong_attention_pallas(
            query, value, W, g, key_padding_mask=mask, s_tile=s_tile)
        jax.block_until_ready((ctx, attn, state))

        ctx_r, attn_r = luong_reference(query, value, W, g, mask)
        assert ctx.shape == (B, Dv) and attn.shape == (S, B), name
        # approx reciprocal in the softmax -> relaxed tolerances
        assert jnp.allclose(ctx, ctx_r, atol=5e-3, rtol=5e-3), name
        assert jnp.allclose(attn, attn_r, atol=5e-3, rtol=5e-3), name
        assert jnp.allclose(state, attn_r, atol=5e-3, rtol=5e-3), name

    root = jax.random.PRNGKey(0)
    keys = jax.random.split(root, 6)
    B, S, Dq, Dv = 2, 8, 32, 16   # batch, src_len, query_dim, value_dim

    run_case("no_mask", keys[0], B, S, Dq, Dv, with_mask=False)
    run_case("mask", keys[1], B, S, Dq, Dv, with_mask=True)
    # exercise the S-chunked online-softmax path (divisible and ragged chunks)
    run_case("s_tiled", keys[2], B, S, Dq, Dv, with_mask=False, s_tile=4)
    run_case("s_tiled_ragged_mask", keys[3], B, S, Dq, Dv, with_mask=True, s_tile=5)
    # exercise batch tiling / padding and the 2-tile megacore split (B >= 16)
    run_case("multi_batch_tile", keys[4], 24, 16, 12, 24, with_mask=False)
    run_case("multi_batch_tile_mask", keys[5], 24, 16, 12, 24, with_mask=True)

    print("KERNEL_OK")
</pallas_src>

<mosaic_0001>
module attributes {stable_mosaic.version = 11 : i64} {
  func.func @_luong_attn_kernel(%arg0: i32, %arg1: i32, %arg2: memref<1xf32, #tpu.memory_space<smem>>, %arg3: memref<2x32xf32, #tpu.memory_space<vmem>>, %arg4: memref<32x16xf32, #tpu.memory_space<vmem>>, %arg5: memref<8x2x16xf32, #tpu.memory_space<vmem>>, %arg6: memref<2x16xf32, #tpu.memory_space<vmem>>, %arg7: memref<1x2x8xf32, #tpu.memory_space<vmem>>, %arg8: memref<2x1xf32, #tpu.memory_space<vmem>>, %arg9: memref<2x1xf32, #tpu.memory_space<vmem>>, %arg10: memref<2x16xf32, #tpu.memory_space<vmem>>) attributes {dimension_semantics = [#tpu.dimension_semantics<parallel>, #tpu.dimension_semantics<arbitrary>], iteration_bounds = array<i64: 1, 1>, scalar_prefetch = 0 : i64, scratch_operands = 3 : i64, tpu.core_type = #tpu.core_type<tc>, window_params = [{transform_indices = @transform_0, window_bounds = array<i64: 1>}, {transform_indices = @transform_1, window_bounds = array<i64: 2, 32>}, {pipeline_mode = #tpu.pipeline_mode<synchronous>, transform_indices = @transform_2, window_bounds = array<i64: 32, 16>}, {transform_indices = @transform_3, window_bounds = array<i64: 8, 2, 16>}, {transform_indices = @transform_4, window_bounds = array<i64: 2, 16>}, {transform_indices = @transform_5, window_bounds = array<i64: 1, 2, 8>}]} {
    %c0_i32 = arith.constant 0 : i32
    %0 = arith.cmpi eq, %arg1, %c0_i32 : i32
    %1 = arith.extui %0 : i1 to i32
    %c0_i32_0 = arith.constant 0 : i32
    %2 = arith.cmpi ne, %1, %c0_i32_0 : i32
    scf.if %2 {
      %cst_28 = arith.constant -2.38197633E+38 : f32
      %48 = vector.broadcast %cst_28 : f32 to vector<2x1xf32>
      %c0_29 = arith.constant 0 : index
      %c0_30 = arith.constant 0 : index
      %49 = vector.load %arg8[%c0_29, %c0_30] : memref<2x1xf32, #tpu.memory_space<vmem>>, vector<2x1xf32>
      tpu.vector_store %arg8[%c0_29, %c0_30], %48 {strides = array<i32>} : memref<2x1xf32, #tpu.memory_space<vmem>>, vector<2x1xf32>,
      %cst_31 = arith.constant 0.000000e+00 : f32
      %50 = vector.broadcast %cst_31 : f32 to vector<2x1xf32>
      %c0_32 = arith.constant 0 : index
      %c0_33 = arith.constant 0 : index
      %51 = vector.load %arg9[%c0_32, %c0_33] : memref<2x1xf32, #tpu.memory_space<vmem>>, vector<2x1xf32>
      tpu.vector_store %arg9[%c0_32, %c0_33], %50 {strides = array<i32>} : memref<2x1xf32, #tpu.memory_space<vmem>>, vector<2x1xf32>,
      %cst_34 = arith.constant 0.000000e+00 : f32
      %52 = vector.broadcast %cst_34 : f32 to vector<2x16xf32>
      %c0_35 = arith.constant 0 : index
      %c0_36 = arith.constant 0 : index
      %53 = vector.load %arg10[%c0_35, %c0_36] : memref<2x16xf32, #tpu.memory_space<vmem>>, vector<2x16xf32>
      tpu.vector_store %arg10[%c0_35, %c0_36], %52 {strides = array<i32>} : memref<2x16xf32, #tpu.memory_space<vmem>>, vector<2x16xf32>,
    } else {
    }
    %c0 = arith.constant 0 : index
    %3 = memref.load %arg2[%c0] : memref<1xf32, #tpu.memory_space<smem>>
    %c0_1 = arith.constant 0 : index
    %c0_2 = arith.constant 0 : index
    %c0_3 = arith.constant 0 : index
    %4 = vector.load %arg5[%c0_1, %c0_2, %c0_3] : memref<8x2x16xf32, #tpu.memory_space<vmem>>, vector<8x2x16xf32>
    %c0_4 = arith.constant 0 : index
    %c0_5 = arith.constant 0 : index
    %5 = vector.load %arg3[%c0_4, %c0_5] : memref<2x32xf32, #tpu.memory_space<vmem>>, vector<2x32xf32>
    %c0_6 = arith.constant 0 : index
    %c0_7 = arith.constant 0 : index
    %6 = vector.load %arg4[%c0_6, %c0_7] : memref<32x16xf32, #tpu.memory_space<vmem>>, vector<32x16xf32>
    %cst = arith.constant dense<0.000000e+00> : vector<2x16xf32>
    %7 = tpu.matmul %5, %6, %cst {dimension_numbers = #tpu.dot_dimension_numbers<[1], [0], [0], [1], [0, 0, 1, 1], [], []>} : vector<2x32xf32>, vector<32x16xf32>, vector<2x16xf32> -> vector<2x16xf32>
    %8 = vector.shape_cast %7 : vector<2x16xf32> to vector<1x2x16xf32>
    %9 = vector.broadcast %8 : vector<1x2x16xf32> to vector<8x2x16xf32>
    %10 = arith.mulf %4, %9 : vector<8x2x16xf32>
    %cst_8 = arith.constant dense<0.000000e+00> : vector<8x2xf32>
    %11 = vector.multi_reduction <add>, %10, %cst_8 [2] : vector<8x2x16xf32> to vector<8x2xf32>
    %12 = tpu.transpose %11, [1, 0] : vector<8x2xf32> -> vector<2x8xf32>
    %13 = vector.broadcast %3 : f32 to vector<2x8xf32>
    %14 = arith.mulf %12, %13 : vector<2x8xf32>
    %15 = arith.index_cast %arg1 : i32 to index
    %c0_9 = arith.constant 0 : index
    %c0_10 = arith.constant 0 : index
    %16 = vector.load %arg7[%15, %c0_9, %c0_10] : memref<1x2x8xf32, #tpu.memory_space<vmem>>, vector<1x2x8xf32>
    %17 = vector.shape_cast %16 : vector<1x2x8xf32> to vector<2x8xf32>
    %18 = vector.shape_cast %14 : vector<2x8xf32> to vector<1x2x8xf32>
    tpu.vector_store %arg7[%15, %c0_9, %c0_10], %18 {strides = array<i32>} : memref<1x2x8xf32, #tpu.memory_space<vmem>>, vector<1x2x8xf32>,
    %c0_11 = arith.constant 0 : index
    %c0_12 = arith.constant 0 : index
    %19 = vector.load %arg8[%c0_11, %c0_12] : memref<2x1xf32, #tpu.memory_space<vmem>>, vector<2x1xf32>
    %cst_13 = arith.constant dense<0xFF800000> : vector<2xf32>
    %20 = vector.multi_reduction <maximumf>, %14, %cst_13 [1] : vector<2x8xf32> to vector<2xf32>
    %21 = vector.shape_cast %20 : vector<2xf32> to vector<2x1xf32>
    %22 = arith.maximumf %19, %21 : vector<2x1xf32>
    %23 = arith.subf %19, %22 : vector<2x1xf32>
    %24 = math.exp %23 : vector<2x1xf32>
    %25 = vector.broadcast %22 : vector<2x1xf32> to vector<2x8xf32>
    %26 = arith.subf %14, %25 : vector<2x8xf32>
    %27 = math.exp %26 : vector<2x8xf32>
    %c0_14 = arith.constant 0 : index
    %c0_15 = arith.constant 0 : index
    %28 = vector.load %arg9[%c0_14, %c0_15] : memref<2x1xf32, #tpu.memory_space<vmem>>, vector<2x1xf32>
    %29 = arith.mulf %24, %28 : vector<2x1xf32>
    %cst_16 = arith.constant dense<0.000000e+00> : vector<2xf32>
    %30 = vector.multi_reduction <add>, %27, %cst_16 [1] : vector<2x8xf32> to vector<2xf32>
    %31 = vector.shape_cast %30 : vector<2xf32> to vector<2x1xf32>
    %32 = arith.addf %29, %31 : vector<2x1xf32>
    %c0_17 = arith.constant 0 : index
    %c0_18 = arith.constant 0 : index
    %33 = vector.load %arg9[%c0_17, %c0_18] : memref<2x1xf32, #tpu.memory_space<vmem>>, vector<2x1xf32>
    tpu.vector_store %arg9[%c0_17, %c0_18], %32 {strides = array<i32>} : memref<2x1xf32, #tpu.memory_space<vmem>>, vector<2x1xf32>,
    %34 = tpu.transpose %27, [1, 0] : vector<2x8xf32> -> vector<8x2xf32>
    %35 = vector.shape_cast %34 : vector<8x2xf32> to vector<8x2x1xf32>
    %36 = vector.broadcast %35 : vector<8x2x1xf32> to vector<8x2x16xf32>
    %37 = arith.mulf %4, %36 : vector<8x2x16xf32>
    %cst_19 = arith.constant dense<0.000000e+00> : vector<2x16xf32>
    %38 = vector.multi_reduction <add>, %37, %cst_19 [0] : vector<8x2x16xf32> to vector<2x16xf32>
    %c0_20 = arith.constant 0 : index
    %c0_21 = arith.constant 0 : index
    %39 = vector.load %arg10[%c0_20, %c0_21] : memref<2x16xf32, #tpu.memory_space<vmem>>, vector<2x16xf32>
    %40 = vector.broadcast %24 : vector<2x1xf32> to vector<2x16xf32>
    %41 = arith.mulf %40, %39 : vector<2x16xf32>
    %42 = arith.addf %41, %38 : vector<2x16xf32>
    %c0_22 = arith.constant 0 : index
    %c0_23 = arith.constant 0 : index
    %43 = vector.load %arg10[%c0_22, %c0_23] : memref<2x16xf32, #tpu.memory_space<vmem>>, vector<2x16xf32>
    tpu.vector_store %arg10[%c0_22, %c0_23], %42 {strides = array<i32>} : memref<2x16xf32, #tpu.memory_space<vmem>>, vector<2x16xf32>,
    %c0_24 = arith.constant 0 : index
    %c0_25 = arith.constant 0 : index
    %44 = vector.load %arg8[%c0_24, %c0_25] : memref<2x1xf32, #tpu.memory_space<vmem>>, vector<2x1xf32>
    tpu.vector_store %arg8[%c0_24, %c0_25], %22 {strides = array<i32>} : memref<2x1xf32, #tpu.memory_space<vmem>>, vector<2x1xf32>,
    %c0_i32_26 = arith.constant 0 : i32
    %45 = arith.cmpi eq, %arg1, %c0_i32_26 : i32
    %46 = arith.extui %45 : i1 to i32
    %c0_i32_27 = arith.constant 0 : i32
    %47 = arith.cmpi ne, %46, %c0_i32_27 : i32
    scf.if %47 {
      %c0_28 = arith.constant 0 : index
      %c0_29 = arith.constant 0 : index
      %48 = vector.load %arg9[%c0_28, %c0_29] : memref<2x1xf32, #tpu.memory_space<vmem>>, vector<2x1xf32>
      %49 = tpu.reciprocal %48 {approx = true} : vector<2x1xf32> -> vector<2x1xf32>
      %c0_30 = arith.constant 0 : index
      %c0_31 = arith.constant 0 : index
      %c0_32 = arith.constant 0 : index
      %50 = vector.load %arg7[%c0_30, %c0_31, %c0_32] : memref<1x2x8xf32, #tpu.memory_space<vmem>>, vector<1x2x8xf32>
      %c0_33 = arith.constant 0 : index
      %c0_34 = arith.constant 0 : index
      %51 = vector.load %arg8[%c0_33, %c0_34] : memref<2x1xf32, #tpu.memory_space<vmem>>, vector<2x1xf32>
      %52 = vector.shape_cast %51 : vector<2x1xf32> to vector<1x2x1xf32>
      %53 = vector.broadcast %52 : vector<1x2x1xf32> to vector<1x2x8xf32>
      %54 = arith.subf %50, %53 : vector<1x2x8xf32>
      %55 = math.exp %54 : vector<1x2x8xf32>
      %56 = vector.shape_cast %49 : vector<2x1xf32> to vector<1x2x1xf32>
      %57 = vector.broadcast %56 : vector<1x2x1xf32> to vector<1x2x8xf32>
      %58 = arith.mulf %55, %57 : vector<1x2x8xf32>
      %c0_35 = arith.constant 0 : index
      %c0_36 = arith.constant 0 : index
      %c0_37 = arith.constant 0 : index
      %59 = vector.load %arg7[%c0_35, %c0_36, %c0_37] : memref<1x2x8xf32, #tpu.memory_space<vmem>>, vector<1x2x8xf32>
      tpu.vector_store %arg7[%c0_35, %c0_36, %c0_37], %58 {strides = array<i32>} : memref<1x2x8xf32, #tpu.memory_space<vmem>>, vector<1x2x8xf32>,
      %c0_38 = arith.constant 0 : index
      %c0_39 = arith.constant 0 : index
      %60 = vector.load %arg10[%c0_38, %c0_39] : memref<2x16xf32, #tpu.memory_space<vmem>>, vector<2x16xf32>
      %61 = vector.broadcast %49 : vector<2x1xf32> to vector<2x16xf32>
      %62 = arith.mulf %60, %61 : vector<2x16xf32>
      %c0_40 = arith.constant 0 : index
      %c0_41 = arith.constant 0 : index
      %63 = vector.load %arg6[%c0_40, %c0_41] : memref<2x16xf32, #tpu.memory_space<vmem>>, vector<2x16xf32>
      tpu.vector_store %arg6[%c0_40, %c0_41], %62 {strides = array<i32>} : memref<2x16xf32, #tpu.memory_space<vmem>>, vector<2x16xf32>,
    } else {
    }
    return
  }
  func.func @transform_0(%arg0: i32, %arg1: i32) -> i32 {
    %c0_i32 = arith.constant 0 : i32
    %c0_i32_0 = arith.constant 0 : i32
    return %c0_i32 : i32
  }
  func.func @transform_1(%arg0: i32, %arg1: i32) -> (i32, i32) {
    %c0_i32 = arith.constant 0 : i32
    %c0_i32_0 = arith.constant 0 : i32
    return %arg0, %c0_i32 : i32, i32
  }
  func.func @transform_2(%arg0: i32, %arg1: i32) -> (i32, i32) {
    %c0_i32 = arith.constant 0 : i32
    %c0_i32_0 = arith.constant 0 : i32
    %c0_i32_1 = arith.constant 0 : i32
    return %c0_i32, %c0_i32_0 : i32, i32
  }
  func.func @transform_3(%arg0: i32, %arg1: i32) -> (i32, i32, i32) {
    %c0_i32 = arith.constant 0 : i32
    %c0_i32_0 = arith.constant 0 : i32
    return %arg1, %arg0, %c0_i32 : i32, i32, i32
  }
  func.func @transform_4(%arg0: i32, %arg1: i32) -> (i32, i32) {
    %c0_i32 = arith.constant 0 : i32
    %c0_i32_0 = arith.constant 0 : i32
    return %arg0, %c0_i32 : i32, i32
  }
  func.func @transform_5(%arg0: i32, %arg1: i32) -> (i32, i32, i32) {
    %c0_i32 = arith.constant 0 : i32
    %c0_i32_0 = arith.constant 0 : i32
    %c0_i32_1 = arith.constant 0 : i32
    return %c0_i32, %arg0, %c0_i32_0 : i32, i32, i32
  }
}

</mosaic_0001>

<bundles_post_ra>
// kernel: tpu_custom_call.1
= control target key start
LH: loop header
LB: loop body
LE: loop exit
PB: predicated region body
PF: predicated region fallthrough
CT: control target
= control target key end

     0   :  { %12 = vsyncpa [#allocation7], 0  ;;  %vm26_vm0 = vcmask 1024   ;;  %v533_v3 = vmov 0.0|0.0   ;;  %v534_v6 = vmov 0.0   ;;  %vm29_vm1 = vcmask 123904   ;;  %s706_s0 = inlined_call_operand.<no memory space> [shape: f32[1], index: 0, kind: input, shape index: {}]   ;;  %s707_s1 = inlined_call_operand.vmem [shape: f32[2,32], index: 1, kind: input, shape index: {}]   ;;  %s708_s2 = inlined_call_operand.vmem [shape: f32[32,16], index: 2, kind: input, shape index: {}]   ;;  %s709_s3 = inlined_call_operand.vmem [shape: f32[8,2,16], index: 3, kind: input, shape index: {}]   ;;  %s710_s4 = inlined_call_operand.hbm [shape: f32[2,16], index: 4, kind: output, shape index: {0}]   ;;  %s711_s5 = inlined_call_operand.hbm [shape: f32[1,2,8], index: 5, kind: output, shape index: {1}]  }
   0x1   :  { %v41_v0 = vld [vmem:[%s708_s2] sm:$0xff]  ;;  %v42_v1 = vld [vmem:[%s708_s2 + $0x8] sm:$0xff]  ;;  %v43_v2 = vld [vmem:[%s708_s2 + $0x10] sm:$0xff]  ;;  %462 = vmatprep.subr.bf16.mxu0 %v533_v3  ;;  %28 = vst.msk [vmem:[#allocation3] sm:$0x3] %vm26_vm0, %v534_v6  ;;  %vm535_vm2 = vmmov 0  }
   0x2   :  { %v463_v4 = vpack.c.bf16 %v42_v1, %v41_v0  ;;  %v44_v5 = vld [vmem:[%s708_s2 + $0x18] sm:$0xff]  ;;  %30 = vst.msk [vmem:[#allocation4] sm:$0x3] %vm29_vm1, %v534_v6  ;;  %459 = vmatprep.mubr.msk.f32.mxu0 %vm535_vm2, %v534_v6 }
   0x3   :  { %13 = vsyncpa [#allocation9], 0  ;;  %v466_v7 = vpack.c.bf16 %v44_v5, %v43_v2  ;;  %v40_v8 = vld [vmem:[%s707_s1] sm:$0x3]  ;;  %vm45_vm3 = vcmask 261120   ;;  %v160_v35 = vlaneseq  ;;  %vm194_vm4 = vcmask 1041409  }
   0x4   :  { %464 = vmatpush3.bf16.msra.mxu0 %v463_v4  ;;  %v590_v9 = vld [vmem:[%s709_s3 + $0x4] sm:$0x3]  ;;  %v595_v10 = vld [vmem:[%s709_s3] sm:$0x3]  ;;  %v600_v12 = vld [vmem:[%s709_s3 + $0x6] sm:$0x3]  ;;  %v241_v62 = vstv %s706_s0 }
   0x5   :  { %465 = vmatprep.subr.bf16.mxu0 %v533_v3  ;;  %v605_v13 = vld [vmem:[%s709_s3 + $0x2] sm:$0x3]  ;;  %v616_v21 = vld [vmem:[%s709_s3 + $0xa] sm:$0x3]  ;;  %v621_v22 = vld [vmem:[%s709_s3 + $0x8] sm:$0x3] }
   0x6   :  { %v630_v27 = vld [vmem:[%s709_s3 + $0xe] sm:$0x3]  ;;  %v635_v28 = vld [vmem:[%s709_s3 + $0xc] sm:$0x3]  ;;  %v161_v36 = vand.u32 127, %v160_v35  ;;  %v643_v37 = vshrl.u32 %v160_v35, 7 }
   0x7   :  { %vm196_vm5 = vcmask 1042434   ;;  %vm198_vm6 = vcmask 1043459   ;;  %vm200_vm7 = vcmask 1044484   ;;  %vm202_vm8 = vcmask 1045509   ;;  %s538_s0 = smov [#allocation8]   ;;  %s539_s19 = smov [#allocation6]  }
   0x8   :  { %467 = vmatpush3.bf16.msra.mxu0 %v466_v7  ;;  %v164_v40 = vsub.s32 %v161_v36, %v643_v37  ;;  %vm204_vm9 = vcmask 1046534   ;;  %vm206_vm10 = vcmask 1047559   ;;  %vm245_vm11 = vcmask 58368   ;;  %s433_s18 = sshll.u32 %s538_s0, 4  ;;  %s423_s20 = sshll.u32 %s539_s19, 4  ;;  %s434_s18 = int_to_ptr.vmem [resolvable:$true] %s433_s18  ;;  %s424_s20 = int_to_ptr.vmem [resolvable:$true] %s423_s20 }
   0x9   :  { %v536_v2 = vmov -2.3819763e+38   ;;  %v537_v3 = vmov 0   ;;  %v333_v36 = vsub.s32 4, %v643_v37  ;;  %s485_s21 = scalar_lea.vmem %s434_s18, 32  ;;  %p490_p1 = scmp.lt.s32.totalorder %s434_s18, %s434_s18 }
   0xa   :  { %27 = vst.msk [vmem:[#allocation2] sm:$0x3] %vm26_vm0, %v536_v2  ;;  %475 = vset.pattern.permute.xlu1 %v537_v3  ;;  %p486_p0 = scmp.ne.s32.totalorder %s434_s18, %s485_s21  ;;  %p491_p2 = scmp.lt.s32.totalorder %s485_s21, %s485_s21 }
   0xb   :  { %460 = vmatmul.mubr.msk.f32.vlgmr.msra.gmra.mrb[0].mxu0 %vm45_vm3, %v40_v8 }
   0xc   :  { %p492_p3 = por %p491_p2, %p490_p1 }
   0xe   :  { %p493_p4 = pnand %p492_p3, %p486_p0 }
  0x11   :  { %v247_v4 = vld [vmem:[#allocation2] sm:$0x3] }
  0xde   :  { %v115_v11 = vpop.f32.mrb[0].mxu0 }
  0xdf   :  { %v461_v14 = vpop.f32.mrb[1].mxu0  ;;  %v121_v15 = vmul.f32 %v115_v11, %v590_v9  ;;  %v119_v16 = vmul.f32 %v115_v11, %v595_v10  ;;  %v122_v19 = vmul.f32 %v115_v11, %v600_v12  ;;  %v120_v20 = vmul.f32 %v115_v11, %v605_v13 }
  0xe0   :  { %v124_v25 = vmul.f32 %v115_v11, %v616_v21  ;;  %v123_v26 = vmul.f32 %v115_v11, %v621_v22  ;;  %v126_v31 = vmul.f32 %v115_v11, %v630_v27  ;;  %v125_v32 = vmul.f32 %v115_v11, %v635_v28 }
  0xe1   :  { %v134_v17 = vsel %vm29_vm1, %v121_v15, 0.0  ;;  %v128_v18 = vsel %vm29_vm1, %v119_v16, 0.0  ;;  %v137_v23 = vsel %vm29_vm1, %v122_v19, 0.0  ;;  %v131_v24 = vsel %vm29_vm1, %v120_v20, 0.0 }
  0xe2   :  { %135 = vadd.xlane.f32.xlu1 %v134_v17  ;;  %129 = vadd.xlane.f32.xlu0 %v128_v18  ;;  %v143_v29 = vsel %vm29_vm1, %v124_v25, 0.0  ;;  %v140_v30 = vsel %vm29_vm1, %v123_v26, 0.0  ;;  %v149_v33 = vsel %vm29_vm1, %v126_v31, 0.0  ;;  %v146_v34 = vsel %vm29_vm1, %v125_v32, 0.0 }
  0xe3   :  { %v305_v19 = vsub.s32 0, %v643_v37  ;;  %v312_v20 = vsub.s32 1, %v643_v37  ;;  %v340_v26 = vsub.s32 5, %v643_v37  ;;  %v347_v32 = vsub.s32 6, %v643_v37 }
  0xe6   :  { %138 = vadd.xlane.f32.xlu1 %v137_v23  ;;  %132 = vadd.xlane.f32.xlu0 %v131_v24 }
  0xea   :  { %144 = vadd.xlane.f32.xlu1 %v143_v29  ;;  %141 = vadd.xlane.f32.xlu0 %v140_v30  ;;  %v319_v29 = vsub.s32 2, %v643_v37 }
  0xee   :  { %150 = vadd.xlane.f32.xlu1 %v149_v33  ;;  %147 = vadd.xlane.f32.xlu0 %v146_v34  ;;  %v326_v33 = vsub.s32 3, %v643_v37 }
 0x16f   :  { %v136_v38 = vpop.xlane.xlu1 %135  ;;  %v130_v39 = vpop.xlane.xlu0 %129 }
 0x170   :  { %v165_v43 = vrot.slane %v130_v39, %v164_v40  ;;  %v173_v45 = vrot.slane %v136_v38, %v164_v40  ;;  %v263_v39 = vld [vmem:[#allocation3] sm:$0x3] }
 0x173   :  { %v139_v41 = vpop.xlane.xlu1 %138  ;;  %v133_v42 = vpop.xlane.xlu0 %132 }
 0x174   :  { %v169_v44 = vrot.slane %v133_v42, %v164_v40  ;;  %v177_v46 = vrot.slane %v139_v41, %v164_v40 }
 0x176   :  { %v195_v47 = vsel %vm194_vm4, %v169_v44, %v165_v43  ;;  %v354_v44 = vsub.s32 7, %v643_v37 }
 0x177   :  { %v197_v48 = vsel %vm196_vm5, %v173_v45, %v195_v47  ;;  %v145_v49 = vpop.xlane.xlu1 %144  ;;  %v142_v50 = vpop.xlane.xlu0 %141 }
 0x178   :  { %v199_v51 = vsel %vm198_vm6, %v177_v46, %v197_v48  ;;  %v181_v52 = vrot.slane %v142_v50, %v164_v40  ;;  %v185_v53 = vrot.slane %v145_v49, %v164_v40 }
 0x17a   :  { %v201_v54 = vsel %vm200_vm7, %v181_v52, %v199_v51 }
 0x17b   :  { %v151_v55 = vpop.xlane.xlu1 %150  ;;  %v148_v56 = vpop.xlane.xlu0 %147  ;;  %v203_v59 = vsel %vm202_vm8, %v185_v53, %v201_v54 }
 0x17c   :  { %v193_v57 = vrot.slane %v151_v55, %v164_v40  ;;  %v189_v58 = vrot.slane %v148_v56, %v164_v40 }
 0x17e   :  { %v205_v60 = vsel %vm204_vm9, %v189_v58, %v203_v59 }
 0x17f   :  { %v207_v61 = vsel %vm206_vm10, %v193_v57, %v205_v60 }
 0x180   :  { %209 = vxpose.xlu0.b32.start.end [1/1] (short) (narrow) %v207_v61, 8 }
 0x200   :  { %v225_v63 = vpop.trf.xlu0 }
 0x201   :  { %v242_v0 = vmul.f32 %v241_v62, %v225_v63 }
 0x203   :  { %v248_v1 = vsel %vm245_vm11, %v242_v0, -inf  ;;  %246 = vst.msk [vmem:[#allocation8] sm:$0x3] %vm245_vm11, %v242_v0 }
 0x204   :  { %249 = vmax.xlane.f32.xlu1 %v248_v1 }
 0x20a   :  { %v397_v1 = vld [vmem:[#allocation8] sm:$0x3] }
 0x291   :  { %v250_v5 = vpop.xlane.xlu1 %249 }
 0x292   :  { %v251_v6 = vmax.f32 %v247_v4, %v250_v5 }
 0x294   :  { %v252_v7 = vsub.f32 %v247_v4, %v251_v6  ;;  %391 = vst.msk [vmem:[#allocation2] sm:$0x3] %vm26_vm0, %v251_v6  ;;  %257 = vperm.xlu1 %475, %v251_v6  }
 0x296   :  { %v253_v18 = vmul.f32 1.442695, %v252_v7 }
 0x29b   :  { %v398_v17 = vld [vmem:[#allocation2] sm:$0x3] }
 0x313   :  { %v258_v8 = vpop.permute.xlu1 %257 }
 0x314   :  { %v260_v11 = vsub.f32 %v242_v0, %v258_v8 }
 0x316   :  { %v261_v14 = vmul.f32 1.442695, %v260_v11 }
 0x318   :  { %477 = vpow2.f32 %v261_v14  ;;  %v382_v14 = vld [vmem:[#allocation4] sm:$0x3] }
 0x319   :  { %479 = vpow2.f32 %v253_v18 }
 0x322   :  { %v478_v15 = vpop.eup %477 }
 0x323   :  { %271 = vxpose.xlu0.b32.start.end [1/1] (short) (narrow) %v478_v15, 8  ;;  %v265_v16 = vsel %vm245_vm11, %v478_v15, 0.0  ;;  %v480_v38 = vpop.eup %479 }
 0x324   :  { %266 = vadd.xlane.f32.xlu1 %v265_v16  ;;  %v264_v40 = vmul.f32 %v480_v38, %v263_v39 }
 0x335   :  { %401 = vperm.xlu1 %475, %v398_v17  }
 0x34c   :  { %476 = vset.pattern.permute.xlu0 %v537_v3 }
 0x3a3   :  { %v287_v23 = vpop.trf.xlu0 }
 0x3a4   :  { %v306_v24 = vrot.slane %v287_v23, %v305_v19  ;;  %v313_v25 = vrot.slane %v287_v23, %v312_v20  ;;  %v341_v30 = vrot.slane %v287_v23, %v340_v26  ;;  %v320_v31 = vrot.slane %v287_v23, %v319_v29 }
 0x3a5   :  { %v348_v34 = vrot.slane %v287_v23, %v347_v32  ;;  %v327_v35 = vrot.slane %v287_v23, %v326_v33  ;;  %v334_v41 = vrot.slane %v287_v23, %v333_v36  ;;  %v355_v45 = vrot.slane %v287_v23, %v354_v44 }
 0x3a6   :  { %308 = vbcast.lane.b32.xlu0 %v306_v24, 256  ;;  %315 = vbcast.lane.b32.xlu1 %v313_v25, 256 }
 0x3aa   :  { %343 = vbcast.lane.b32.xlu0 %v341_v30, 256  ;;  %322 = vbcast.lane.b32.xlu1 %v320_v31, 256 }
 0x3ae   :  { %350 = vbcast.lane.b32.xlu0 %v348_v34, 256  ;;  %329 = vbcast.lane.b32.xlu1 %v327_v35, 256 }
 0x3b1   :  { %v267_v42 = vpop.xlane.xlu1 %266 }
 0x3b2   :  { %v268_v43 = vadd.f32 %v267_v42, %v264_v40  ;;  %336 = vbcast.lane.b32.xlu1 %v334_v41, 256 }
 0x3b4   :  { %270 = vst.msk [vmem:[#allocation3] sm:$0x3] %vm26_vm0, %v268_v43 }
 0x3b5   :  { %v402_v48 = vpop.permute.xlu1 %401 }
 0x3b6   :  { %385 = vperm.xlu1 %475, %v480_v38   ;;  %v404_v4 = vsub.f32 %v397_v1, %v402_v48 }
 0x3b8   :  { %v405_v7 = vmul.f32 1.442695, %v404_v4 }
 0x3ba   :  { %357 = vbcast.lane.b32.xlu1 %v355_v45, 256 }
 0x3bb   :  { %v395_v46 = vld [vmem:[#allocation3] sm:$0x3] }
 0x3bc   :  { %481 = vrcp.f32 %v395_v46 }
 0x3bd   :  { %483 = vpow2.f32 %v405_v7 }
 0x3c6   :  { %v482_v47 = vpop.eup %481 }
 0x3c7   :  { %409 = vperm.xlu0 %476, %v482_v47  }
 0x418   :  { %v316_v49 = vpop.permute.xlu1 %315  ;;  %v309_v51 = vpop.permute.xlu0 %308 }
 0x419   :  { %v359_v53 = vmul.f32 %v309_v51, %v595_v10  ;;  %v360_v54 = vmul.f32 %v316_v49, %v605_v13 }
 0x41b   :  { %v367_v37 = vsel %vm29_vm1, %v359_v53, 0.0  ;;  %v368_v57 = vsel %vm29_vm1, %v360_v54, 0.0 }
 0x41c   :  { %v323_v50 = vpop.permute.xlu1 %322  ;;  %v369_v61 = vadd.f32 %v368_v57, %v367_v37  ;;  %v344_v62 = vpop.permute.xlu0 %343 }
 0x41d   :  { %v361_v55 = vmul.f32 %v323_v50, %v590_v9  ;;  %v364_v9 = vmul.f32 %v344_v62, %v616_v21 }
 0x41f   :  { %v370_v59 = vsel %vm29_vm1, %v361_v55, 0.0 }
 0x420   :  { %v330_v52 = vpop.permute.xlu1 %329  ;;  %v371_v10 = vadd.f32 %v370_v59, %v369_v61  ;;  %v351_v2 = vpop.permute.xlu0 %350 }
 0x421   :  { %v362_v58 = vmul.f32 %v330_v52, %v600_v12  ;;  %v376_v12 = vsel %vm29_vm1, %v364_v9, 0.0  ;;  %v365_v6 = vmul.f32 %v351_v2, %v635_v28  ;;  %v484_v28 = vpop.eup %483 }
 0x423   :  { %v372_v63 = vsel %vm29_vm1, %v362_v58, 0.0  ;;  %v378_v11 = vsel %vm29_vm1, %v365_v6, 0.0 }
 0x424   :  { %v337_v56 = vpop.permute.xlu1 %336  ;;  %v373_v0 = vadd.f32 %v372_v63, %v371_v10 }
 0x425   :  { %v363_v60 = vmul.f32 %v337_v56, %v621_v22 }
 0x427   :  { %v374_v13 = vsel %vm29_vm1, %v363_v60, 0.0 }
 0x428   :  { %v375_v3 = vadd.f32 %v374_v13, %v373_v0 }
 0x42a   :  { %v377_v22 = vadd.f32 %v376_v12, %v375_v3 }
 0x42c   :  { %v379_v16 = vadd.f32 %v378_v11, %v377_v22 }
 0x435   :  { %v386_v5 = vpop.permute.xlu1 %385 }
 0x436   :  { %v388_v17 = vmul.f32 %v386_v5, %v382_v14 }
 0x439   :  { %v358_v8 = vpop.permute.xlu1 %357 }
 0x43a   :  { %v366_v15 = vmul.f32 %v358_v8, %v630_v27 }
 0x43c   :  { %v380_v21 = vsel %vm29_vm1, %v366_v15, 0.0 }
 0x43d   :  { %v381_v18 = vadd.f32 %v380_v21, %v379_v16 }
 0x43f   :  { %v389_v19 = vadd.f32 %v388_v17, %v381_v18 }
 0x441   :  { %390 = vst.msk [vmem:[#allocation4] sm:$0x3] %vm29_vm1, %v389_v19 }
 0x446   :  { %v410_v20 = vpop.permute.xlu0 %409 }
 0x447   :  { %v412_v23 = vmul.f32 %v484_v28, %v410_v20 }
 0x448   :  { %v414_v24 = vld [vmem:[#allocation4] sm:$0x3] }
 0x449   :  { %v415_v25 = vmul.f32 %v414_v24, %v410_v20  ;;  %413 = vst.msk [vmem:[#allocation8] sm:$0x3] %vm245_vm11, %v412_v23 }
 0x44a   :  { %496 = shalt.err (!%p493_p4)
}
 0x44b   :  { %s497_s24 = scalar_lea.hbm %s711_s5, 32 }
 0x44c   :  { %p498_p5 = scmp.ne.s32.totalorder %s711_s5, %s497_s24  ;;  %p501_p6 = scmp.lt.u32.totalorder %s497_s24, %s711_s5 }
 0x44e   :  { %p503_p7 = pnand %p501_p6, %p498_p5 }
 0x450   :  { %506 = shalt.err (!%p503_p7)
}
 0x451   :  { %436 = dma.vmem_to_hbm [thread:$0]  %s434_s18, 32, %s711_s5, [#allocation9]   ;;  %416 = vst.msk [vmem:[#allocation6] sm:$0x3] %vm29_vm1, %v415_v25 }
 0x452   :  { %s507_s30 = scalar_lea.vmem %s424_s20, 32  ;;  %p512_p9 = scmp.lt.s32.totalorder %s424_s20, %s424_s20 }
 0x453   :  { %p508_p8 = scmp.ne.s32.totalorder %s424_s20, %s507_s30  ;;  %p513_p10 = scmp.lt.s32.totalorder %s507_s30, %s507_s30 }
 0x455   :  { %p514_p11 = por %p513_p10, %p512_p9 }
 0x457   :  { %p515_p12 = pnand %p514_p11, %p508_p8 }
 0x459   :  { %518 = shalt.err (!%p515_p12)
}
 0x45a   :  { %s519_s8 = scalar_lea.hbm %s710_s4, 32 }
 0x45b   :  { %p520_p13 = scmp.ne.s32.totalorder %s710_s4, %s519_s8  ;;  %p523_p0 = scmp.lt.u32.totalorder %s519_s8, %s710_s4 }
 0x45d   :  { %p525_p1 = pnand %p523_p0, %p520_p13 }
 0x45f   :  { %528 = shalt.err (!%p525_p1)
}
 0x460   :  { %426 = dma.vmem_to_hbm [thread:$0]  %s424_s20, 32, %s710_s4, [#allocation7]  }
 0x461   :  { %529 = dma.done.wait [#allocation7], 32  }
 0x462   :  { %530 = vsyncadd [#allocation7], 4294967264 }
 0x463   :  { %531 = dma.done.wait [#allocation9], 32  }
 0x464   :  { %532 = vsyncadd [#allocation9], 4294967264 }
 0x465   :  { %443 = vsyncpa [#allocation7], 1 }
 0x466   :  { %444 = vsyncpa [#allocation9], 1 }

</bundles_post_ra>
